<compile_context>
chip_gen: v7x
topology: tpu7x:2x2x1
jax: 0.10.0
libtpu: 0.0.40
codegen_flags: <defaults>
</compile_context>

<pallas_src>
import functools

import jax
import jax.numpy as jnp
from jax.experimental import pallas as pl
from jax.experimental.pallas import tpu as pltpu


def gap_classifier_kernel(emb_ref, w_ref, b_ref, labels_ref,
                          logits_ref, loss_ref, acc_ref,
                          *, seq_len, num_labels):
    """Grid = (batch_tiles, seq_tiles); seq axis is the reduction ('arbitrary')."""
    s = pl.program_id(1)

    @pl.when(s == 0)
    def _():
        acc_ref[...] = jnp.zeros_like(acc_ref)

    # Streaming partial sum over this sequence tile (accumulate in f32 so the
    # kernel also accepts bf16 hidden states).
    emb = emb_ref[...].astype(jnp.float32)            # (Bt, St, H)
    acc_ref[...] += jnp.sum(emb, axis=1)              # (Bt, H)

    @pl.when(s == pl.num_programs(1) - 1)
    def _():
        gap = acc_ref[...] * (1.0 / seq_len)          # (Bt, H)  mean over S

        # Lane-dense classifier: (H, Lpad) @ -> (Bt, Lpad), f32 accumulation.
        logits = jnp.dot(gap, w_ref[...],
                         preferred_element_type=jnp.float32) + b_ref[...]
        logits_ref[...] = logits

        # Cross entropy (per-example; padded lanes excluded from logsumexp).
        bt, lpad = logits.shape
        col = jax.lax.broadcasted_iota(jnp.int32, (bt, lpad), 1)
        valid = col < num_labels
        masked = jnp.where(valid, logits, -1e30)
        m = jnp.max(masked, axis=-1, keepdims=True)             # (Bt, 1)
        lse = m[:, 0] + jnp.log(jnp.sum(jnp.exp(masked - m), axis=-1))  # (Bt,)
        labels = labels_ref[...][:, 0]                          # (Bt,) i32
        onehot = col == labels[:, None]
        true_logit = jnp.sum(jnp.where(onehot, logits, 0.0), axis=-1)   # (Bt,)
        loss_ref[...] = (lse - true_logit)[:, None]             # (Bt, 1)


def _choose_seq_tile(S, Bt, H, itemsize, budget_bytes=8 << 20):
    """Largest sequence tile dividing S that is sublane-aligned (or == S) and
    keeps a double-buffered embedding tile within `budget_bytes` (sized for
    v7x's 64 MiB VMEM; plenty of headroom on v5e/v6e)."""
    def fits(st):
        return 2 * Bt * st * H * itemsize <= budget_bytes
    if fits(S):
        return S
    best = None
    for st in range(8, S, 8):
        if S % st == 0 and fits(st):
            best = st
    return best if best is not None else S


def classification_head(embeddings, weight, bias, labels=None,
                        *, block_b=None, block_s=None, lane_pad=128):
    """embeddings: (B, S, H); weight: (L, H) torch layout; bias: (L,); labels: (B,) i32."""
    B, S, H = embeddings.shape
    L = weight.shape[0]
    Lpad = ((L + lane_pad - 1) // lane_pad) * lane_pad
    itemsize = embeddings.dtype.itemsize

    # Lane-dense, zero-padded classifier parameters.
    w_pad = jnp.zeros((H, Lpad), jnp.float32).at[:, :L].set(weight.T.astype(jnp.float32))
    b_pad = jnp.zeros((1, Lpad), jnp.float32).at[:, :L].set(bias.astype(jnp.float32))

    # Tile selection (batch tile sublane-aligned when possible).
    if block_b is None:
        block_b = 8 if B % 8 == 0 else B
    if block_s is None:
        block_s = _choose_seq_tile(S, block_b, H, itemsize)
    assert B % block_b == 0 and S % block_s == 0, "tiles must divide (B, S)"

    have_labels = labels is not None
    labels_arr = labels if have_labels else jnp.zeros((B,), jnp.int32)
    labels2d = labels_arr.astype(jnp.int32).reshape(B, 1)

    grid = (B // block_b, S // block_s)
    kernel = functools.partial(gap_classifier_kernel, seq_len=S, num_labels=L)

    cost = pl.CostEstimate(
        flops=int(B * S * H + 2 * B * H * Lpad + 6 * B * Lpad),
        transcendentals=int(B * Lpad + B),
        bytes_accessed=int(B * S * H * itemsize + H * Lpad * 4
                           + B * Lpad * 4 + B * 4 + B * 4),
    )

    logits_pad, loss_per_ex = pl.pallas_call(
        kernel,
        out_shape=(
            jax.ShapeDtypeStruct((B, Lpad), jnp.float32),
            jax.ShapeDtypeStruct((B, 1), jnp.float32),
        ),
        grid_spec=pltpu.PrefetchScalarGridSpec(
            num_scalar_prefetch=0,
            grid=grid,
            in_specs=[
                pl.BlockSpec((block_b, block_s, H), lambda b, s: (b, s, 0)),  # embeddings
                pl.BlockSpec((H, Lpad), lambda b, s: (0, 0)),                 # weight (resident)
                pl.BlockSpec((1, Lpad), lambda b, s: (0, 0)),                 # bias (resident)
                pl.BlockSpec((block_b, 1), lambda b, s: (b, 0)),              # labels
            ],
            out_specs=(
                pl.BlockSpec((block_b, Lpad), lambda b, s: (b, 0)),           # logits (lane dense)
                pl.BlockSpec((block_b, 1), lambda b, s: (b, 0)),              # per-example loss
            ),
            scratch_shapes=[pltpu.VMEM((block_b, H), jnp.float32)],           # GAP accumulator
        ),
        compiler_params=pltpu.CompilerParams(
            dimension_semantics=("parallel", "arbitrary"),
            vmem_limit_bytes=64 * 1024 * 1024,
        ),
        cost_estimate=cost,
    )(embeddings, w_pad, b_pad, labels2d)

    logits = logits_pad[:, :L]
    loss = jnp.mean(loss_per_ex) if have_labels else None
    return logits, loss


if __name__ == "__main__":
    # Small shapes consistent with the module's forward (sized so the grid is
    # genuinely 2x2: batch tiles of 8, sequence tiles of 8).
    B, S, H, L, V = 16, 16, 32, 5, 64   # batch, seq, hidden_size, num_labels, vocab

    key = jax.random.PRNGKey(0)
    k_ids, k_tbl, k_w, k_b, k_lab = jax.random.split(key, 5)

    # --- synthetic base_model (glue): embedding lookup -> last hidden states ---
    input_ids = jax.random.randint(k_ids, (B, S), 0, V)
    embed_table = jax.random.normal(k_tbl, (V, H), dtype=jnp.float32) * 0.1
    embeddings = embed_table[input_ids]                          # (B, S, H)

    # --- classifier (nn.Linear(hidden_size, num_labels)) parameters ---
    weight = jax.random.normal(k_w, (L, H), dtype=jnp.float32) * 0.05  # torch layout (L, H)
    bias = jax.random.normal(k_b, (L,), dtype=jnp.float32) * 0.05
    labels = jax.random.randint(k_lab, (B,), 0, L)

    logits, loss = classification_head(embeddings, weight, bias, labels,
                                       block_b=8, block_s=8)
    jax.block_until_ready((logits, loss))

    # --- pure-JAX reference check (silent on success) ---
    gap_ref = embeddings.mean(axis=1)
    logits_ref = gap_ref @ weight.T + bias
    lse_ref = jax.nn.logsumexp(logits_ref, axis=-1)
    loss_ref = jnp.mean(lse_ref - logits_ref[jnp.arange(B), labels])
    assert jnp.allclose(logits, logits_ref, atol=1e-5, rtol=1e-5)
    assert jnp.allclose(loss, loss_ref, atol=1e-5, rtol=1e-5)

    print("KERNEL_OK")
</pallas_src>

<mosaic_0001>
module attributes {stable_mosaic.version = 11 : i64} {
  func.func @gap_classifier_kernel(%arg0: i32, %arg1: i32, %arg2: memref<8x8x32xf32, #tpu.memory_space<vmem>>, %arg3: memref<32x128xf32, #tpu.memory_space<vmem>>, %arg4: memref<1x128xf32, #tpu.memory_space<vmem>>, %arg5: memref<8x1xi32, #tpu.memory_space<vmem>>, %arg6: memref<8x128xf32, #tpu.memory_space<vmem>>, %arg7: memref<8x1xf32, #tpu.memory_space<vmem>>, %arg8: memref<8x32xf32, #tpu.memory_space<vmem>>) attributes {dimension_semantics = [#tpu.dimension_semantics<parallel>, #tpu.dimension_semantics<arbitrary>], iteration_bounds = array<i64: 2, 2>, scalar_prefetch = 0 : i64, scratch_operands = 1 : i64, tpu.core_type = #tpu.core_type<tc>, window_params = [{transform_indices = @transform_0, window_bounds = array<i64: 8, 8, 32>}, {pipeline_mode = #tpu.pipeline_mode<synchronous>, transform_indices = @transform_1, window_bounds = array<i64: 32, 128>}, {pipeline_mode = #tpu.pipeline_mode<synchronous>, transform_indices = @transform_2, window_bounds = array<i64: 1, 128>}, {transform_indices = @transform_3, window_bounds = array<i64: 8, 1>}, {transform_indices = @transform_4, window_bounds = array<i64: 8, 128>}, {transform_indices = @transform_5, window_bounds = array<i64: 8, 1>}]} {
    %c0_i32 = arith.constant 0 : i32
    %0 = arith.cmpi eq, %arg1, %c0_i32 : i32
    %1 = arith.extui %0 : i1 to i32
    %c0_i32_0 = arith.constant 0 : i32
    %2 = arith.cmpi ne, %1, %c0_i32_0 : i32
    scf.if %2 {
      %cst_8 = arith.constant 0.000000e+00 : f32
      %11 = vector.broadcast %cst_8 : f32 to vector<8x32xf32>
      %c0_9 = arith.constant 0 : index
      %c0_10 = arith.constant 0 : index
      %12 = vector.load %arg8[%c0_9, %c0_10] : memref<8x32xf32, #tpu.memory_space<vmem>>, vector<8x32xf32>
      tpu.vector_store %arg8[%c0_9, %c0_10], %11 {strides = array<i32>} : memref<8x32xf32, #tpu.memory_space<vmem>>, vector<8x32xf32>,
    } else {
    }
    %c0 = arith.constant 0 : index
    %c0_1 = arith.constant 0 : index
    %c0_2 = arith.constant 0 : index
    %3 = vector.load %arg2[%c0, %c0_1, %c0_2] : memref<8x8x32xf32, #tpu.memory_space<vmem>>, vector<8x8x32xf32>
    %c0_3 = arith.constant 0 : index
    %c0_4 = arith.constant 0 : index
    %4 = vector.load %arg8[%c0_3, %c0_4] : memref<8x32xf32, #tpu.memory_space<vmem>>, vector<8x32xf32>
    %cst = arith.constant dense<0.000000e+00> : vector<8x32xf32>
    %5 = vector.multi_reduction <add>, %3, %cst [1] : vector<8x8x32xf32> to vector<8x32xf32>
    %6 = arith.addf %4, %5 : vector<8x32xf32>
    %c0_5 = arith.constant 0 : index
    %c0_6 = arith.constant 0 : index
    %7 = vector.load %arg8[%c0_5, %c0_6] : memref<8x32xf32, #tpu.memory_space<vmem>>, vector<8x32xf32>
    tpu.vector_store %arg8[%c0_5, %c0_6], %6 {strides = array<i32>} : memref<8x32xf32, #tpu.memory_space<vmem>>, vector<8x32xf32>,
    %c1_i32 = arith.constant 1 : i32
    %8 = arith.cmpi eq, %arg1, %c1_i32 : i32
    %9 = arith.extui %8 : i1 to i32
    %c0_i32_7 = arith.constant 0 : i32
    %10 = arith.cmpi ne, %9, %c0_i32_7 : i32
    scf.if %10 {
      %c0_8 = arith.constant 0 : index
      %c0_9 = arith.constant 0 : index
      %11 = vector.load %arg8[%c0_8, %c0_9] : memref<8x32xf32, #tpu.memory_space<vmem>>, vector<8x32xf32>
      %cst_10 = arith.constant 6.250000e-02 : f32
      %12 = vector.broadcast %cst_10 : f32 to vector<8x32xf32>
      %13 = arith.mulf %11, %12 : vector<8x32xf32>
      %c0_11 = arith.constant 0 : index
      %c0_12 = arith.constant 0 : index
      %14 = vector.load %arg3[%c0_11, %c0_12] : memref<32x128xf32, #tpu.memory_space<vmem>>, vector<32x128xf32>
      %cst_13 = arith.constant dense<0.000000e+00> : vector<8x128xf32>
      %15 = tpu.matmul %13, %14, %cst_13 {dimension_numbers = #tpu.dot_dimension_numbers<[1], [0], [0], [1], [0, 0, 1, 1], [], []>} : vector<8x32xf32>, vector<32x128xf32>, vector<8x128xf32> -> vector<8x128xf32>
      %c0_14 = arith.constant 0 : index
      %c0_15 = arith.constant 0 : index
      %16 = vector.load %arg4[%c0_14, %c0_15] : memref<1x128xf32, #tpu.memory_space<vmem>>, vector<1x128xf32>
      %17 = vector.broadcast %16 : vector<1x128xf32> to vector<8x128xf32>
      %18 = arith.addf %15, %17 : vector<8x128xf32>
      %c0_16 = arith.constant 0 : index
      %c0_17 = arith.constant 0 : index
      %19 = vector.load %arg6[%c0_16, %c0_17] : memref<8x128xf32, #tpu.memory_space<vmem>>, vector<8x128xf32>
      tpu.vector_store %arg6[%c0_16, %c0_17], %18 {strides = array<i32>} : memref<8x128xf32, #tpu.memory_space<vmem>>, vector<8x128xf32>,
      %20 = tpu.iota {dimensions = array<i32: 1>} : vector<8x128xi32>
      %c5_i32 = arith.constant 5 : i32
      %21 = vector.broadcast %c5_i32 : i32 to vector<8x128xi32>
      %22 = arith.cmpi slt, %20, %21 : vector<8x128xi32>
      %cst_18 = arith.constant -1.000000e+30 : f32
      %23 = vector.broadcast %cst_18 : f32 to vector<8x128xf32>
      %24 = arith.select %22, %18, %23 : vector<8x128xi1>, vector<8x128xf32>
      %cst_19 = arith.constant dense<0xFF800000> : vector<8xf32>
      %25 = vector.multi_reduction <maximumf>, %24, %cst_19 [1] : vector<8x128xf32> to vector<8xf32>
      %26 = vector.shape_cast %25 : vector<8xf32> to vector<8x1xf32>
      %27 = vector.shape_cast %26 : vector<8x1xf32> to vector<8xf32>
      %28 = vector.broadcast %26 : vector<8x1xf32> to vector<8x128xf32>
      %29 = arith.subf %24, %28 : vector<8x128xf32>
      %30 = math.exp %29 : vector<8x128xf32>
      %cst_20 = arith.constant dense<0.000000e+00> : vector<8xf32>
      %31 = vector.multi_reduction <add>, %30, %cst_20 [1] : vector<8x128xf32> to vector<8xf32>
      %32 = math.log %31 : vector<8xf32>
      %33 = arith.addf %27, %32 : vector<8xf32>
      %c0_21 = arith.constant 0 : index
      %c0_22 = arith.constant 0 : index
      %34 = vector.load %arg5[%c0_21, %c0_22] : memref<8x1xi32, #tpu.memory_space<vmem>>, vector<8x1xi32>
      %35 = vector.shape_cast %34 : vector<8x1xi32> to vector<8xi32>
      %36 = vector.shape_cast %35 : vector<8xi32> to vector<8x1xi32>
      %37 = vector.broadcast %36 : vector<8x1xi32> to vector<8x128xi32>
      %38 = arith.cmpi eq, %20, %37 : vector<8x128xi32>
      %cst_23 = arith.constant 0.000000e+00 : f32
      %39 = vector.broadcast %cst_23 : f32 to vector<8x128xf32>
      %40 = arith.select %38, %18, %39 : vector<8x128xi1>, vector<8x128xf32>
      %cst_24 = arith.constant dense<0.000000e+00> : vector<8xf32>
      %41 = vector.multi_reduction <add>, %40, %cst_24 [1] : vector<8x128xf32> to vector<8xf32>
      %42 = arith.subf %33, %41 : vector<8xf32>
      %43 = vector.shape_cast %42 : vector<8xf32> to vector<8x1xf32>
      %c0_25 = arith.constant 0 : index
      %c0_26 = arith.constant 0 : index
      %44 = vector.load %arg7[%c0_25, %c0_26] : memref<8x1xf32, #tpu.memory_space<vmem>>, vector<8x1xf32>
      tpu.vector_store %arg7[%c0_25, %c0_26], %43 {strides = array<i32>} : memref<8x1xf32, #tpu.memory_space<vmem>>, vector<8x1xf32>,
    } else {
    }
    return
  }
  func.func @transform_0(%arg0: i32, %arg1: i32) -> (i32, i32, i32) {
    %c0_i32 = arith.constant 0 : i32
    %c0_i32_0 = arith.constant 0 : i32
    return %arg0, %arg1, %c0_i32 : i32, i32, i32
  }
  func.func @transform_1(%arg0: i32, %arg1: i32) -> (i32, i32) {
    %c0_i32 = arith.constant 0 : i32
    %c0_i32_0 = arith.constant 0 : i32
    %c0_i32_1 = arith.constant 0 : i32
    return %c0_i32, %c0_i32_0 : i32, i32
  }
  func.func @transform_2(%arg0: i32, %arg1: i32) -> (i32, i32) {
    %c0_i32 = arith.constant 0 : i32
    %c0_i32_0 = arith.constant 0 : i32
    %c0_i32_1 = arith.constant 0 : i32
    return %c0_i32, %c0_i32_0 : i32, i32
  }
  func.func @transform_3(%arg0: i32, %arg1: i32) -> (i32, i32) {
    %c0_i32 = arith.constant 0 : i32
    %c0_i32_0 = arith.constant 0 : i32
    return %arg0, %c0_i32 : i32, i32
  }
  func.func @transform_4(%arg0: i32, %arg1: i32) -> (i32, i32) {
    %c0_i32 = arith.constant 0 : i32
    %c0_i32_0 = arith.constant 0 : i32
    return %arg0, %c0_i32 : i32, i32
  }
  func.func @transform_5(%arg0: i32, %arg1: i32) -> (i32, i32) {
    %c0_i32 = arith.constant 0 : i32
    %c0_i32_0 = arith.constant 0 : i32
    return %arg0, %c0_i32 : i32, i32
  }
}

</mosaic_0001>

<bundles_post_ra>
// kernel: tpu_custom_call.1
= control target key start
LH: loop header
LB: loop body
LE: loop exit
PB: predicated region body
PF: predicated region fallthrough
CT: control target
= control target key end

     0   :  { %s1680_s0 = inlined_call_operand.hbm [shape: f32[16,16,32], index: 0, kind: input, shape index: {}]   ;;  %s1681_s1 = inlined_call_operand.hbm [shape: f32[32,128], index: 1, kind: input, shape index: {}]   ;;  %s1682_s2 = inlined_call_operand.hbm [shape: f32[1,128], index: 2, kind: input, shape index: {}]   ;;  %s1683_s3 = inlined_call_operand.hbm [shape: s32[16,1], index: 3, kind: input, shape index: {}]   ;;  %s1684_s4 = inlined_call_operand.hbm [shape: f32[16,128], index: 4, kind: output, shape index: {0}]   ;;  %s1685_s5 = inlined_call_operand.hbm [shape: f32[16,1], index: 5, kind: output, shape index: {1}]  }
   0x1   :  { %1701 = sst [smem:[#allocation21_spill]] %s1680_s0 }
   0x2   :  { %1702 = sst [smem:[#allocation22_spill]] %s1681_s1 }
   0x3   :  { %1703 = sst [smem:[#allocation23_spill]] %s1682_s2 }
   0x4   :  { %1704 = sst [smem:[#allocation24_spill]] %s1683_s3 }
   0x5   :  { %1705 = sst [smem:[#allocation25_spill]] %s1684_s4 }
   0x6   :  { %1706 = sst [smem:[#allocation26_spill]] %s1685_s5 }
   0x7   :  { %11 = vsyncpa [#allocation4], 0 }
   0x8   :  { %13 = vsyncpa [#allocation4 + $0x1], 0 }
   0x9   :  { %14 = vsyncpa [#allocation7], 0 }
   0xa   :  { %15 = vsyncpa [#allocation10], 0 }
   0xb   :  { %17 = vsyncpa [#allocation10 + $0x1], 0 }
   0xc   :  { %18 = vsyncpa [#allocation5], 0 }
   0xd   :  { %20 = vsyncpa [#allocation5 + $0x1], 0 }
   0xe   :  { %21 = vsyncpa [#allocation13], 0 }
   0xf   :  { %23 = vsyncpa [#allocation13 + $0x1], 0  ;;  %s1259_s18 = smov 0   ;;  %s1261_s19 = smov 0  }
  0x10   :  { %s1263_s20 = smov 0   ;;  %s1265_s21 = smov 0  }
  0x11   :  { %s1267_s22 = smov 0   ;;  %s1269_s23 = smov 0  }
  0x12   :  { %s1271_s24 = smov 0   ;;  %s1273_s25 = smov 0  }
  0x13   :  { %s1275_s26 = smov 0   ;;  %s1277_s27 = smov 0  }
  0x14   :  { %s1279_s28 = smov 0  }
  0x15 LB: > { %1707 = sst [smem:[#allocation19_spill]] %s1201_s25  ;;  %s1690_s29 = sadd.s32 4294967295, %s1213_s28   ;;  %s1213_s28 = sphi %s1279_s28, %s29_s28   ;;  %s1209_s27 = sphi %s1277_s27, %s1748_s27   ;;  %s1205_s26 = sphi %s1275_s26, %s1747_s26   ;;  %s1201_s25 = sphi %s1273_s25, %s1746_s25   ;;  %s1197_s24 = sphi %s1271_s24, %s1745_s24   ;;  %s1193_s23 = sphi %s1269_s23, %s1744_s23   ;;  %s1189_s22 = sphi %s1267_s22, %s1743_s22   ;;  %s1185_s21 = sphi %s1265_s21, %s1742_s21   ;;  %s1181_s20 = sphi %s1263_s20, %s1741_s20   ;;  %s1177_s19 = sphi %s1261_s19, %s1740_s19   ;;  %s1173_s18 = sphi %s1259_s18, %s1739_s18  }
  0x16   : > { %p63_p0 = scmp.ne.s32.totalorder %s1189_s22, %s1185_s21  ;;  %p1316_p1 = scmp.eq.s32.totalorder %s1690_s29, 0 }
  0x17   : > { %p739_p2 = scmp.ge.s32.totalorder %s1213_s28, 1  ;;  %p194_p3 = scmp.lt.s32.totalorder %s1213_s28, 5 }
  0x18   : > { %s1708_s30 = scalar_select %p1316_p1, 1, 0 }
  0x19   : > { %p1324_p4 = por %p1316_p1, %p63_p0  ;;  %p1328_p5 = pnand %p739_p2, %p194_p3 }
  0x1a   : > { %s1215_s8 = smov [#allocation6]   ;;  %s1216_s11 = smov [#allocation8]  }
  0x1b   : > { %s1709_s6 = scalar_select %p1324_p4, 1, 0 }
  0x1c   : > { %s1710_s7 = scalar_select %p1328_p5, 1, 0 }
  0x1d   : > { %s206_s9 = sshll.u32 %s1215_s8, 4  ;;  %p805_p6 = pneg %p1328_p5  ;;  %s207_s9 = int_to_ptr.vmem [resolvable:$true] %s206_s9 }
  0x1e   : > { %s220_s12 = sshll.u32 %s1216_s11, 4  ;;  %s1712_s1 = sld [smem:[#allocation22_spill]]  ;;  %s1340_s12 = int_to_ptr.vmem [resolvable:$true] %s220_s12 }
  0x1f   : > { %p1336_p7 = pnand %p805_p6, %p1316_p1 }
  0x21   : > { %p937_p9 = pneg %p1336_p7 }
  0x24   : > { %s935_s15 = scalar_lea.hbm %s1712_s1, 512 }
  0x25   : > { %p936_p8 = scmp.ne.s32.totalorder %s1712_s1, %s935_s15  ;;  %p942_p12 = scmp.lt.u32.totalorder %s935_s15, %s1712_s1 }
  0x27   : > { %p938_p10 = pnand %p937_p9, %p936_p8 }
  0x29   : > { %p939_p11 = pneg %p938_p10 }
  0x2b   : > { %p944_p13 = pnand %p942_p12, %p939_p11 }
  0x2d   : > { %947 = shalt.err (!%p944_p13)
}
  0x2e   : > { %s948_s11 = scalar_lea.vmem %s207_s9, 512  ;;  %p956_p6 = scmp.lt.s32.totalorder %s207_s9, %s207_s9 }
  0x2f   : > { %p949_p0 = scmp.ne.s32.totalorder %s207_s9, %s948_s11  ;;  %p957_p4 = scmp.lt.s32.totalorder %s948_s11, %s948_s11 }
  0x31   : > { %p951_p2 = pnand %p949_p0, %p937_p9  ;;  %p958_p5 = por %p957_p4, %p956_p6 }
  0x33   : > { %p952_p3 = pneg %p951_p2 }
  0x35   : > { %p959_p1 = pnand %p958_p5, %p952_p3 }
  0x37   : > { %962 = shalt.err (!%p959_p1)
}
  0x38   : > { %s1693_s13 = smov 128   ;;  %s1694_s14 = smov 8  }
  0x39   : > { %808 = dma.hbm_to_vmem [thread:$0]  (!%p1336_p7), %s1712_s1, 512, %s207_s9, [#allocation7], %s1693_s13, %s1693_s13, %s1694_s14  }
  0x3a   : > { %s1713_s2 = sld [smem:[#allocation23_spill]] }
  0x40   : > { %s963_s8 = scalar_lea.hbm %s1713_s2, 16 }
  0x41   : > { %p964_p1 = scmp.ne.s32.totalorder %s1713_s2, %s963_s8  ;;  %p970_p8 = scmp.lt.u32.totalorder %s963_s8, %s1713_s2 }
  0x43   : > { %p966_p4 = pnand %p964_p1, %p937_p9 }
  0x45   : > { %p967_p5 = pneg %p966_p4 }
  0x47   : > { %p972_p10 = pnand %p970_p8, %p967_p5 }
  0x49   : > { %975 = shalt.err (!%p972_p10)
}
  0x4a   : > { %s976_s9 = scalar_lea.vmem %s1340_s12, 16  ;;  %s983_s29 = scalar_lea.vmem %s1340_s12, 32 }
  0x4b   : > { %p977_p11 = scmp.ne.s32.totalorder %s1340_s12, %s976_s9  ;;  %p984_p0 = scmp.lt.s32.totalorder %s1340_s12, %s1340_s12 }
  0x4c   : > { %p985_p2 = scmp.lt.s32.totalorder %s983_s29, %s976_s9 }
  0x4d   : > { %p979_p12 = pnand %p977_p11, %p937_p9 }
  0x4e   : > { %p986_p3 = por %p985_p2, %p984_p0 }
  0x4f   : > { %p980_p13 = pneg %p979_p12 }
  0x51   : > { %p987_p6 = pnand %p986_p3, %p980_p13 }
  0x53   : > { %990 = shalt.err (!%p987_p6)
}
  0x54   : > { %811 = dma.hbm_to_vmem [thread:$0]  (!%p1336_p7), %s1713_s2, 16, %s1340_s12, [#allocation7]  }
  0x55   : > { %s38_s15 = sadd.s32 1, %s1205_s26  ;;  %s41_s10 = sadd.s32 1, %s1209_s27 }
  0x56   : > { %p39_p9 = scmp.ge.s32.totalorder %s38_s15, 2  ;;  %s50_s16 = sadd.s32 1, %s1193_s23 }
  0x57   : > { %p57_p1 = scmp.ne.s32.totalorder %s1193_s23, %s1189_s22  ;;  %p58_p4 = scmp.eq.s32.totalorder %s1213_s28, 0 }
  0x58   : > { %s1750_s15 = smov (%p39_p9, %s38_s15), 0  ;;  %s1752_s10 = smov (!%p39_p9, %s41_s10), %s1209_s27 }
  0x59   : > { %1714 = sst [smem:[#allocation20_spill]] %s1750_s15  ;;  %s46_s17 = ssub.s32 %s1205_s26, %s1750_s15 }
  0x5a   : > { %p1406_p5 = por %p58_p4, %p57_p1  ;;  %p43_p7 = scmp.ge.s32.totalorder %s1752_s10, 2 }
  0x5b   : > { %p1697_p8 = scmp.lt.s32.totalorder %s1213_s28, 4  ;;  %s231_s12 = sand.u32 1, %s1193_s23  }
  0x5c   : > { %s766_s8 = sshll.u32 %s1209_s27, 4  ;;  %s1754_s10 = smov (%p43_p7, %s1752_s10), 0 }
  0x5d   : > { %s743_s11 = sshll.u32 %s231_s12, 6  ;;  %s1417_s9 = ssub.s32 %s1209_s27, %s1754_s10 }
  0x5e   : > { %s47_s29 = sor.u32 %s46_s17, %s1417_s9  ;;  %s241_s4 = sadd.s32 %s1205_s26, %s766_s8 }
  0x5f   : > { %p48_p10 = scmp.eq.s32.totalorder %s47_s29, 0  ;;  %s746_s5 = sshll.u32 %s241_s4, 7 }
  0x60   : > { %s1716_s0 = sld [smem:[#allocation21_spill]]  ;;  %s235_s2 = scalar_lea.vmem [#allocation3], %s743_s11 }
  0x61   : > { %s244_s15 = sshll.u32 %s235_s2, 4  ;;  %p1435_p11 = pnand %p1697_p8, %p1406_p5  ;;  %s1429_s15 = int_to_ptr.vmem [resolvable:$true] %s244_s15 }
  0x62   : > { %s1427_s25 = scalar_select %p48_p10, %s1193_s23, %s50_s16  }
  0x63   : > { %s1439_s13 = scalar_lea.sflag [#allocation4], %s231_s12  ;;  %p993_p13 = pneg %p1435_p11 }
  0x66   : > { %s1424_s1 = scalar_lea.hbm %s1716_s0, %s746_s5  ;;  %s996_s21 = scalar_lea.hbm %s1716_s0, 4096 }
  0x67   : > { %s991_s14 = scalar_lea.hbm %s1424_s1, 1024  ;;  %p997_p3 = scmp.lt.u32.totalorder %s1424_s1, %s1716_s0 }
  0x68   : > { %p992_p12 = scmp.ne.s32.totalorder %s1424_s1, %s991_s14  ;;  %p998_p6 = scmp.lt.u32.totalorder %s996_s21, %s991_s14 }
  0x69   : > { %p1000_p1 = scmp.lt.u32.totalorder %s991_s14, %s1424_s1 }
  0x6a   : > { %p994_p0 = pnand %p993_p13, %p992_p12  ;;  %p999_p9 = por %p998_p6, %p997_p3 }
  0x6c   : > { %p995_p2 = pneg %p994_p0  ;;  %p1001_p5 = por %p1000_p1, %p999_p9 }
  0x6e   : > { %p1002_p7 = pnand %p1001_p5, %p995_p2 }
  0x70   : > { %1005 = shalt.err (!%p1002_p7)
}
  0x71   : > { %s1006_s12 = scalar_lea.vmem %s1429_s15, 1024  ;;  %s1219_s29 = smov [#allocation3]  }
  0x72   : > { %p1007_p10 = scmp.ne.s32.totalorder %s1429_s15, %s1006_s12  ;;  %s1011_s4 = sshll.u32 %s1219_s29, 4  ;;  %s1012_s4 = int_to_ptr.vmem [resolvable:$false] %s1011_s4 }
  0x73   : > { %s1013_s5 = scalar_lea.vmem %s1012_s4, 2048  ;;  %p1014_p8 = scmp.lt.s32.totalorder %s1429_s15, %s1012_s4 }
  0x74   : > { %p1009_p12 = pnand %p1007_p10, %p993_p13  ;;  %p1015_p3 = scmp.lt.s32.totalorder %s1013_s5, %s1006_s12 }
  0x76   : > { %p1010_p0 = pneg %p1009_p12  ;;  %p1016_p6 = por %p1015_p3, %p1014_p8 }
  0x78   : > { %p1017_p9 = pnand %p1016_p6, %p1010_p0 }
  0x7a   : > { %1020 = shalt.err (!%p1017_p9)
}
  0x7b   : > { %s1220_s14 = smov 256   ;;  %s1718_s2 = smov 8  }
  0x7c   : > { %s1719_s16 = smov 128   ;;  %s738_s17 = sadd.s32 4294967294, %s1213_s28  }
  0x7d   : > { %815 = dma.hbm_to_vmem [thread:$0]  (!%p1435_p11), %s1424_s1, 1024, %s1429_s15, %s1439_s13, %s1220_s14, %s1719_s16, %s1718_s2  }
  0x7e   : > { %p116_p8 = scmp.eq.s32.totalorder %s1417_s9, 0  ;;  %s118_s21 = sadd.s32 1, %s1181_s20 }
  0x7f   : > { %p125_p13 = scmp.ne.s32.totalorder %s1181_s20, %s1177_s19  ;;  %p131_p1 = scmp.ne.s32.totalorder %s1177_s19, %s1173_s18 }
  0x80   : > { %s1475_s8 = scalar_select %p116_p8, %s1181_s20, %s118_s21  }
  0x81   : > { %p1479_p2 = por %p125_p13, %p58_p4  ;;  %s1721_s12 = sadd.s32 4294967295, %s1213_s28  }
  0x82   : > { %p155_p5 = scmp.eq.s32.totalorder %s1721_s12, 3  ;;  %p161_p7 = scmp.eq.s32.totalorder %s738_s17, 3 }
  0x83   : > { %p1722_p10 = scmp.ne.s32.totalorder %s1708_s30, 0  ;;  %s254_s15 = sand.u32 1, %s1181_s20  }
  0x84   : > { %p1494_p11 = por %p155_p5, %p125_p13  ;;  %p1498_p0 = por %p161_p7, %p131_p1 }
  0x85   : > { %p1489_p12 = por %p131_p1, %p1722_p10  ;;  %s747_s29 = sshll.u32 %s254_s15, 3 }
  0x86   : > { %s1724_s9 = scalar_select %p1494_p11, 1, 0 }
  0x87   : > { %s1725_s13 = scalar_select %p1498_p0, 1, 0 }
  0x88   : > { %s748_s4 = sshll.u32 %s1209_s27, 7  ;;  %s1726_s3 = sld [smem:[#allocation24_spill]] }
  0x89   : > { %s258_s16 = scalar_lea.vmem [#allocation9], %s747_s29  ;;  %p1727_p4 = scmp.lt.s32.totalorder %s1213_s28, 4 }
  0x8a   : > { %s265_s17 = sshll.u32 %s258_s16, 4  ;;  %s255_s12 = scalar_lea.sflag [#allocation10], %s254_s15  ;;  %s1508_s17 = int_to_ptr.vmem [resolvable:$true] %s265_s17 }
  0x8b   : > { %p1514_p3 = pnand %p1727_p4, %p1479_p2 }
  0x8d   : > { %p1023_p9 = pneg %p1514_p3 }
  0x8e   : > { %s1506_s2 = scalar_lea.hbm %s1726_s3, %s748_s4  ;;  %s1026_s11 = scalar_lea.hbm %s1726_s3, 256 }
  0x8f   : > { %s1021_s5 = scalar_lea.hbm %s1506_s2, 128  ;;  %p1027_p2 = scmp.lt.u32.totalorder %s1506_s2, %s1726_s3 }
  0x90   : > { %p1022_p6 = scmp.ne.s32.totalorder %s1506_s2, %s1021_s5  ;;  %p1028_p1 = scmp.lt.u32.totalorder %s1026_s11, %s1021_s5 }
  0x91   : > { %p1030_p7 = scmp.lt.u32.totalorder %s1021_s5, %s1506_s2 }
  0x92   : > { %p1024_p8 = pnand %p1023_p9, %p1022_p6  ;;  %p1029_p5 = por %p1028_p1, %p1027_p2 }
  0x94   : > { %p1025_p13 = pneg %p1024_p8  ;;  %p1031_p10 = por %p1030_p7, %p1029_p5 }
  0x96   : > { %p1032_p4 = pnand %p1031_p10, %p1025_p13 }
  0x98   : > { %1035 = shalt.err (!%p1032_p4)
}
  0x99   : > { %s1036_s15 = scalar_lea.vmem %s1508_s17, 128  ;;  %s1221_s29 = smov [#allocation9]  }
  0x9a   : > { %p1037_p6 = scmp.ne.s32.totalorder %s1508_s17, %s1036_s15  ;;  %s1041_s4 = sshll.u32 %s1221_s29, 4  ;;  %s1042_s4 = int_to_ptr.vmem [resolvable:$false] %s1041_s4 }
  0x9b   : > { %s1043_s14 = scalar_lea.vmem %s1042_s4, 256  ;;  %p1044_p11 = scmp.lt.s32.totalorder %s1508_s17, %s1042_s4 }
  0x9c   : > { %p1039_p8 = pnand %p1037_p6, %p1023_p9  ;;  %p1045_p2 = scmp.lt.s32.totalorder %s1043_s14, %s1036_s15 }
  0x9e   : > { %p1040_p0 = pneg %p1039_p8  ;;  %p1046_p1 = por %p1045_p2, %p1044_p11 }
  0xa0   : > { %p1047_p5 = pnand %p1046_p1, %p1040_p0 }
  0xa2   : > { %1050 = shalt.err (!%p1047_p5)
}
  0xa3   : > { %818 = dma.hbm_to_vmem [thread:$0]  (!%p1514_p3), %s1506_s2, 128, %s1508_s17, %s255_s12  }
  0xa4   : > { %p1729_p13 = scmp.ne.s32.totalorder %s1710_s7, 0 }
  0xa5   : > { %s276_s5 = sand.u32 (!%p1729_p13), 1, %s1189_s22   ;;  %p1730_p9 = scmp.ne.s32.totalorder (!%p1729_p13), %s1709_s6, 0 }
  0xa6   : > { %274 = sbr.rel (%p1729_p13) target bundleno = 807 (0x327), region = 36  ;;  %s750_s11 = sshll.u32 (!%p1729_p13), %s276_s5, 6 }
  0xa7   : > { %s277_s16 = scalar_lea.sflag (!%p1729_p13), [#allocation4], %s276_s5  ;;  %s280_s29 = scalar_lea.vmem (!%p1729_p13), [#allocation3], %s750_s11 }
  0xad   : > { %1152 = dma.done.wait (%p1730_p9), %s277_s16, 1024  }
  0xae   : > { %1154 = vsyncadd (%p1730_p9), %s277_s16, 4294966272  ;;  %p1731_p11 = scmp.ne.s32.totalorder %s1708_s30, 0 }
  0xb0   : > { %1156 = dma.done.wait (%p1731_p11), [#allocation7], 528  }
  0xb1   : > { %1158 = vsyncadd (%p1731_p11), [#allocation7], 4294966768  ;;  %s1555_s7 = sand.u32 1, %s1177_s19  }
  0xb2   : > { %s1558_s2 = sshll.u32 %s1555_s7, 3  ;;  %s294_s17 = scalar_lea.sflag [#allocation10], %s1555_s7 }
  0xb3   : > { %s297_s21 = scalar_lea.vmem [#allocation9], %s1558_s2 }
  0xb4   : > { %1160 = dma.done.wait (%p1489_p12), %s294_s17, 128  }
  0xb5   : > { %1162 = vsyncadd (%p1489_p12), %s294_s17, 4294967168  ;;  %s326_s30 = scalar_lea.vmem [#allocation11], %s1558_s2  ;;  %s1699_s6 = scalar_lea.vmem [#allocation12], %s1558_s2 }
  0xb6   : > { %p756_p0 = scmp.ne.s32.totalorder %s1197_s24, 0 }
  0xb7   : > { %vm339_vm0 = vcmask (!%p756_p0), 261120   ;;  %v1222_v0 = vmov (!%p756_p0), 0.0  }
  0xb8   : > { %338 = sbr.rel (%p756_p0) target bundleno = 191 (0xbf), region = 56  ;;  %340 = vst.msk [vmem:[#allocation2] sm:$0xff] (!%p756_p0), %vm339_vm0, %v1222_v0 }
  0xbf PF: > { %v341_v1 = vld [vmem:[%s280_s29] sm:$0xff]  ;;  %v342_v2 = vld [vmem:[%s280_s29 + $0x8] sm:$0xff]  ;;  %v343_v3 = vld [vmem:[%s280_s29 + $0x10] sm:$0xff]  ;;  %vm350_vm1 = vcmask 261120   ;;  %vm415_vm2 = vcmask 1041409   ;;  %vm417_vm3 = vcmask 1042434  }
  0xc0   : > { %v344_v4 = vld [vmem:[%s280_s29 + $0x18] sm:$0xff]  ;;  %v345_v5 = vld [vmem:[%s280_s29 + $0x20] sm:$0xff]  ;;  %v346_v6 = vld [vmem:[%s280_s29 + $0x28] sm:$0xff]  ;;  %v351_v7 = vsel %vm350_vm1, %v341_v1, 0.0  ;;  %v358_v8 = vsel %vm350_vm1, %v342_v2, 0.0  ;;  %v365_v9 = vsel %vm350_vm1, %v343_v3, 0.0 }
  0xc1   : > { %v347_v10 = vld [vmem:[%s280_s29 + $0x30] sm:$0xff]  ;;  %v348_v11 = vld [vmem:[%s280_s29 + $0x38] sm:$0xff]  ;;  %v352_v12 = vrot.slane %v351_v7, 4  ;;  %v359_v13 = vrot.slane %v358_v8, 4  ;;  %v366_v14 = vrot.slane %v365_v9, 4  ;;  %v372_v15 = vsel %vm350_vm1, %v344_v4, 0.0 }
  0xc2   : > { %v379_v16 = vsel %vm350_vm1, %v345_v5, 0.0  ;;  %v386_v17 = vsel %vm350_vm1, %v346_v6, 0.0  ;;  %v393_v18 = vsel %vm350_vm1, %v347_v10, 0.0  ;;  %v373_v22 = vrot.slane %v372_v15, 4  ;;  %v349_v5 = vld [vmem:[#allocation2] sm:$0xff]  ;;  %p757_p12 = scmp.ne.s32.totalorder %s1197_s24, 1 }
  0xc3   : > { %v353_v19 = vadd.f32 %v352_v12, %v351_v7  ;;  %v360_v20 = vadd.f32 %v359_v13, %v358_v8  ;;  %v367_v21 = vadd.f32 %v366_v14, %v365_v9  ;;  %v380_v23 = vrot.slane %v379_v16, 4  ;;  %v438_v10 = vld [vmem:[#allocation6] sm:$0xff] (!%p757_p12)  ;;  %v440_v12 = vld [vmem:[#allocation6 + $0x10] sm:$0xff] (!%p757_p12) }
  0xc4   : > { %v387_v24 = vrot.slane %v386_v17, 4  ;;  %v394_v25 = vrot.slane %v393_v18, 4  ;;  %v400_v26 = vsel %vm350_vm1, %v348_v11, 0.0  ;;  %v374_v30 = vadd.f32 %v373_v22, %v372_v15  ;;  %v439_v11 = vld [vmem:[#allocation6 + $0x8] sm:$0xff] (!%p757_p12)  ;;  %v441_v15 = vld [vmem:[#allocation6 + $0x18] sm:$0xff] (!%p757_p12) }
  0xc5   : > { %v354_v27 = vrot.slane %v353_v19, 2  ;;  %v361_v28 = vrot.slane %v360_v20, 2  ;;  %v368_v29 = vrot.slane %v367_v21, 2  ;;  %v381_v31 = vadd.f32 %v380_v23, %v379_v16  ;;  %v758_v23 = vld [vmem:[#allocation8] ss:$0 sm:$0xff] (!%p757_p12) }
  0xc6   : > { %v388_v32 = vadd.f32 %v387_v24, %v386_v17  ;;  %v395_v33 = vadd.f32 %v394_v25, %v393_v18  ;;  %v401_v34 = vrot.slane %v400_v26, 4  ;;  %v375_v38 = vrot.slane %v374_v30, 2 }
  0xc7   : > { %v355_v35 = vadd.f32 %v354_v27, %v353_v19  ;;  %v362_v36 = vadd.f32 %v361_v28, %v360_v20  ;;  %v369_v37 = vadd.f32 %v368_v29, %v367_v21  ;;  %v382_v39 = vrot.slane %v381_v31, 2  ;;  %v537_v28 = vld [vmem:[%s297_s21] sm:$0xff] (!%p757_p12) }
  0xc8   : > { %v389_v40 = vrot.slane %v388_v32, 2  ;;  %v396_v41 = vrot.slane %v395_v33, 2  ;;  %v402_v42 = vadd.f32 %v401_v34, %v400_v26  ;;  %v376_v46 = vadd.f32 %v375_v38, %v374_v30 }
  0xc9   : > { %v356_v43 = vrot.slane %v355_v35, 1  ;;  %v363_v44 = vrot.slane %v362_v36, 1  ;;  %v370_v45 = vrot.slane %v369_v37, 1  ;;  %v383_v47 = vadd.f32 %v382_v39, %v381_v31 }
  0xca   : > { %v390_v48 = vadd.f32 %v389_v40, %v388_v32  ;;  %v397_v49 = vadd.f32 %v396_v41, %v395_v33  ;;  %v403_v50 = vrot.slane %v402_v42, 2  ;;  %v377_v54 = vrot.slane %v376_v46, 1 }
  0xcb   : > { %v357_v51 = vadd.f32 %v356_v43, %v355_v35  ;;  %v364_v52 = vadd.f32 %v363_v44, %v362_v36  ;;  %v371_v53 = vadd.f32 %v370_v45, %v369_v37  ;;  %v384_v55 = vrot.slane %v383_v47, 1 }
  0xcc   : > { %v391_v56 = vrot.slane %v390_v48, 1  ;;  %v398_v57 = vrot.slane %v397_v49, 1  ;;  %v404_v58 = vadd.f32 %v403_v50, %v402_v42  ;;  %v378_v59 = vadd.f32 %v377_v54, %v376_v46 }
  0xcd   : > { %v416_v60 = vsel %vm415_vm2, %v364_v52, %v357_v51  ;;  %vm419_vm4 = vcmask 1043459   ;;  %v385_v61 = vadd.f32 %v384_v55, %v383_v47  ;;  %vm421_vm5 = vcmask 1044484  }
  0xce   : > { %v392_v62 = vadd.f32 %v391_v56, %v390_v48  ;;  %v405_v63 = vrot.slane %v404_v58, 1  ;;  %v399_v0 = vadd.f32 %v398_v57, %v397_v49  ;;  %v418_v1 = vsel %vm417_vm3, %v371_v53, %v416_v60 }
  0xcf   : > { %vm423_vm6 = vcmask 1045509   ;;  %v420_v3 = vsel %vm419_vm4, %v378_v59, %v418_v1  ;;  %vm425_vm7 = vcmask 1046534   ;;  %vm427_vm8 = vcmask 1047559  }
  0xd0   : > { %v406_v2 = vadd.f32 %v405_v63, %v404_v58  ;;  %v422_v4 = vsel %vm421_vm5, %v385_v61, %v420_v3  ;;  %435 = sbr.rel (%p757_p12) target bundleno = 756 (0x2f4), region = 60  ;;  %v1223_v13 = vmov (!%p757_p12), 0.0|0.0   ;;  %v784_v14 = vpack.c.bf16 (!%p757_p12), %v439_v11, %v438_v10 }
  0xd1   : > { %v424_v6 = vsel %vm423_vm6, %v392_v62, %v422_v4  ;;  %783 = vmatprep.subr.bf16.mxu0 (!%p757_p12), %v1223_v13  ;;  %vm1224_vm9 = vmmov (!%p757_p12), 0   ;;  %v1225_v16 = vmov (!%p757_p12), 0.0   ;;  %v787_v17 = vpack.c.bf16 (!%p757_p12), %v441_v15, %v440_v12 }
  0xd2   : > { %v426_v7 = vsel %vm425_vm7, %v399_v0, %v424_v6  ;;  %780 = vmatprep.mubr.msk.f32.mxu0 (!%p757_p12), %vm1224_vm9, %v1225_v16  ;;  %785 = vmatpush3.bf16.msra.mxu0 (!%p757_p12), %v784_v14  ;;  %v1226_v20 = vmov (!%p757_p12), 0   ;;  %v523_v21 = vlaneseq (!%p757_p12)  ;;  %vm546_vm12 = vcmask (!%p757_p12), 7168  }
  0xd3   : > { %v428_v8 = vsel %vm427_vm8, %v406_v2, %v426_v7  ;;  %786 = vmatprep.subr.bf16.mxu0 (!%p757_p12), %v1223_v13  ;;  %930 = vset.pattern.permute.xlu0 (!%p757_p12), %v1226_v20 }
  0xd4   : > { %v430_v9 = vadd.f32 %v428_v8, %v349_v5  ;;  %v524_v22 = vand.u32 (!%p757_p12), 127, %v523_v21 }
  0xd6   : > { %431 = vst.msk [vmem:[#allocation2] sm:$0xff] %vm350_vm1, %v430_v9  ;;  %788 = vmatpush3.bf16.msra.mxu0 (!%p757_p12), %v787_v17  ;;  %vm525_vm10 = vcmp.lt.s32.totalorder (!%p757_p12), %v524_v22, 5 }
  0xdd   : > { %v436_v18 = vld [vmem:[#allocation2] sm:$0xff] }
  0xde   : > { %v437_v19 = vmul.f32 0.0625, %v436_v18 }
  0xe0   : > { %781 = vmatmul.mubr.msk.f32.vlgmr.msra.gmra.mrb[0].mxu0 %vm350_vm1, %v437_v19 }
 0x1b3   : > { %v518_v24 = vpop.f32.mrb[0].mxu0 }
 0x1b4   : > { %v519_v25 = vadd.f32 %v758_v23, %v518_v24  ;;  %v782_v26 = vpop.f32.mrb[1].mxu0 }
 0x1b6   : > { %522 = vst [vmem:[%s326_s30] sm:$0xff] %v519_v25  ;;  %v526_v27 = vsel %vm525_vm10, %v519_v25, -1e+30 }
 0x1b7   : > { %527 = vmax.xlane.f32.xlu0 %v526_v27 }
 0x1cd   : > { %539 = vperm.xlu0 %930, %v537_v28  }
 0x244   : > { %v528_v29 = vpop.xlane.xlu0 %527 }
 0x245   : > { %v529_v30 = vsub.f32 %v526_v27, %v528_v29 }
 0x247   : > { %v530_v31 = vmul.f32 1.442695, %v529_v30 }
 0x249   : > { %931 = vpow2.f32 %v530_v31 }
 0x24c   : > { %v540_v32 = vpop.permute.xlu0 %539 }
 0x24d   : > { %vm541_vm11 = vcmp.eq.s32.totalorder %v524_v22, %v540_v32 }
 0x24e   : > { %v542_v34 = vsel %vm541_vm11, %v519_v25, 0.0 }
 0x253   : > { %v932_v33 = vpop.eup %931 }
 0x254   : > { %532 = vadd.xlane.f32.xlu1 %v932_v33 }
 0x258   : > { %543 = vadd.xlane.f32.xlu1 %v542_v34 }
 0x2e1   : > { %v533_v35 = vpop.xlane.xlu1 %532 }
 0x2e2   : > { %933 = vlog2.f32 %v533_v35 }
 0x2e5   : > { %v544_v39 = vpop.xlane.xlu1 %543 }
 0x2ec   : > { %v934_v36 = vpop.eup %933 }
 0x2ed   : > { %v535_v37 = vmul.f32 0.6931472, %v934_v36 }
 0x2ef   : > { %v536_v38 = vadd.f32 %v535_v37, %v528_v29 }
 0x2f1   : > { %v545_v40 = vsub.f32 %v536_v38, %v544_v39 }
 0x2f3   : > { %547 = vst.msk [vmem:[%s1699_s6] sm:$0xff] %vm546_vm12, %v545_v40 }
 0x2f4 PF: > { %s1732_s24 = sld [smem:[#allocation19_spill]]  ;;  %s1733_s4 = sld [smem:[#allocation25_spill]] }
 0x2f5   : > { %s567_s5 = sshll.u32 %s326_s30, 4  ;;  %s549_s11 = scalar_lea.sflag [#allocation5], %s1555_s7  ;;  %s568_s5 = int_to_ptr.vmem [resolvable:$true] %s567_s5 }
 0x2f6   : > { %s1051_s16 = scalar_lea.vmem %s568_s5, 128  ;;  %p1734_p7 = scmp.ne.s32.totalorder %s1724_s9, 0 }
 0x2f7   : > { %p1052_p3 = scmp.ne.s32.totalorder %s568_s5, %s1051_s16  ;;  %s1227_s29 = smov [#allocation11]  }
 0x2f8   : > { %s1055_s17 = sshll.u32 %s1227_s29, 4  ;;  %s1056_s17 = int_to_ptr.vmem [resolvable:$false] %s1055_s17 }
 0x2f9   : > { %p1053_p10 = pnand %p1052_p3, %p1734_p7  ;;  %s1057_s21 = scalar_lea.vmem %s1056_s17, 256 }
 0x2fa   : > { %s762_s1 = sshll.u32 %s1732_s24, 7  ;;  %p1058_p6 = scmp.lt.s32.totalorder %s568_s5, %s1056_s17 }
 0x2fb   : > { %s1594_s14 = scalar_lea.hbm %s1733_s4, %s762_s1  ;;  %p1054_p4 = pneg %p1053_p10 }
 0x2fc   : > { %p1059_p8 = scmp.lt.s32.totalorder %s1057_s21, %s1051_s16 }
 0x2fe   : > { %p1060_p2 = por %p1059_p8, %p1058_p6 }
 0x300   : > { %p1061_p1 = pnand %p1060_p2, %p1054_p4 }
 0x302   : > { %1064 = shalt.err (!%p1061_p1)
}
 0x303   : > { %s1065_s30 = scalar_lea.hbm %s1594_s14, 128  ;;  %s1069_s29 = scalar_lea.hbm %s1733_s4, 256 }
 0x304   : > { %p1066_p5 = scmp.ne.s32.totalorder %s1594_s14, %s1065_s30  ;;  %p1070_p11 = scmp.lt.u32.totalorder %s1594_s14, %s1733_s4 }
 0x305   : > { %p1071_p0 = scmp.lt.u32.totalorder %s1069_s29, %s1065_s30  ;;  %p1073_p3 = scmp.lt.u32.totalorder %s1065_s30, %s1594_s14 }
 0x306   : > { %p1067_p13 = pnand %p1066_p5, %p1734_p7 }
 0x307   : > { %p1072_p12 = por %p1071_p0, %p1070_p11 }
 0x308   : > { %p1068_p9 = pneg %p1067_p13 }
 0x309   : > { %p1074_p10 = por %p1073_p3, %p1072_p12 }
 0x30b   : > { %p1075_p4 = pnand %p1074_p10, %p1068_p9 }
 0x30d   : > { %1078 = shalt.err (!%p1075_p4)
}
 0x30e   : > { %801 = dma.vmem_to_hbm [thread:$0]  (%p1734_p7), %s568_s5, 128, %s1594_s14, %s549_s11  }
 0x30f   : > { %s1735_s12 = sld [smem:[#allocation26_spill]]  ;;  %s1736_s15 = scalar_lea.vmem [#allocation12], %s1558_s2 }
 0x310   : > { %s580_s29 = sshll.u32 %s1736_s15, 4  ;;  %s554_s30 = scalar_lea.sflag [#allocation13], %s1555_s7  ;;  %s581_s29 = int_to_ptr.vmem [resolvable:$true] %s580_s29 }
 0x311   : > { %s1079_s17 = scalar_lea.vmem %s581_s29, 128  ;;  %s1228_s0 = smov [#allocation12]  }
 0x312   : > { %p1080_p6 = scmp.ne.s32.totalorder %s581_s29, %s1079_s17  ;;  %s1083_s3 = sshll.u32 %s1228_s0, 4  ;;  %s1084_s3 = int_to_ptr.vmem [resolvable:$false] %s1083_s3 }
 0x313   : > { %s1085_s4 = scalar_lea.vmem %s1084_s3, 256  ;;  %p1086_p1 = scmp.lt.s32.totalorder %s581_s29, %s1084_s3 }
 0x314   : > { %p1081_p8 = pnand %p1080_p6, %p1734_p7  ;;  %p1087_p5 = scmp.lt.s32.totalorder %s1085_s4, %s1079_s17 }
 0x315   : > { %s1621_s6 = scalar_lea.hbm %s1735_s12, %s762_s1 }
 0x316   : > { %p1082_p2 = pneg %p1081_p8  ;;  %p1088_p13 = por %p1087_p5, %p1086_p1 }
 0x318   : > { %p1089_p9 = pnand %p1088_p13, %p1082_p2 }
 0x31a   : > { %1092 = shalt.err (!%p1089_p9)
}
 0x31b   : > { %s1093_s7 = scalar_lea.hbm %s1621_s6, 128  ;;  %s1097_s0 = scalar_lea.hbm %s1735_s12, 256 }
 0x31c   : > { %p1094_p11 = scmp.ne.s32.totalorder %s1621_s6, %s1093_s7  ;;  %p1098_p3 = scmp.lt.u32.totalorder %s1621_s6, %s1735_s12 }
 0x31d   : > { %p1099_p10 = scmp.lt.u32.totalorder %s1097_s0, %s1093_s7  ;;  %p1101_p6 = scmp.lt.u32.totalorder %s1093_s7, %s1621_s6 }
 0x31e   : > { %p1095_p0 = pnand %p1094_p11, %p1734_p7 }
 0x31f   : > { %p1100_p4 = por %p1099_p10, %p1098_p3 }
 0x320   : > { %p1096_p12 = pneg %p1095_p0 }
 0x321   : > { %p1102_p8 = por %p1101_p6, %p1100_p4 }
 0x323   : > { %p1103_p2 = pnand %p1102_p8, %p1096_p12 }
 0x325   : > { %1106 = shalt.err (!%p1103_p2)
}
 0x326   : > { %802 = dma.vmem_to_hbm [thread:$0]  (%p1734_p7), %s581_s29, 128, %s1621_s6, %s554_s30  }
 0x327 PF: > { %p831_p1 = scmp.ge.s32.totalorder %s1213_s28, 2  ;;  %s592_s4 = sand.u32 1, %s1173_s18  }
 0x328   : > { %p1737_p5 = scmp.ne.s32.totalorder %s1725_s13, 0  ;;  %s593_s14 = scalar_lea.sflag [#allocation5], %s592_s4 }
 0x32a   : > { %p820_p13 = pnand %p831_p1, %p1737_p5 }
 0x32c   : > { %1164 = dma.done.wait (!%p820_p13), %s593_s14, 128  }
 0x32d   : > { %1166 = vsyncadd (!%p820_p13), %s593_s14, 4294967168  ;;  %s602_s5 = scalar_lea.sflag [#allocation13], %s592_s4 }
 0x32e   : > { %1168 = dma.done.wait (!%p820_p13), %s602_s5, 128  }
 0x32f   : > { %1170 = vsyncadd (!%p820_p13), %s602_s5, 4294967168  ;;  %s29_s28 = sadd.s32 1, %s1213_s28   ;;  %s1738_s9 = sld [smem:[#allocation20_spill]] }
 0x330   : > { %p26_p9 = scmp.ge.s32.totalorder %s29_s28, 6   ;;  %s1739_s18 = smov %s1177_s19 }
 0x331   : > { %s1740_s19 = smov %s1181_s20  ;;  %s1741_s20 = smov %s1475_s8 }
 0x332   : > { %s1742_s21 = smov %s1189_s22  ;;  %s1743_s22 = smov %s1193_s23 }
 0x333   : > { %s1744_s23 = smov %s1427_s25  ;;  %s1745_s24 = smov %s1205_s26 }
 0x334   : > { %s1746_s25 = smov %s1209_s27  ;;  %s1748_s27 = smov %s1754_s10 }
 0x335   : > { %s1747_s26 = smov %s1738_s9  ;;  %28 = sbr.rel (!%p26_p9) target bundleno = 21 (0x15), region = 127 }
 0x33c   :  { %607 = vsyncpa [#allocation4], 1 }
 0x33d   :  { %609 = vsyncpa [#allocation4 + $0x1], 1 }
 0x33e   :  { %610 = vsyncpa [#allocation7], 1 }
 0x33f   :  { %611 = vsyncpa [#allocation10], 1 }
 0x340   :  { %613 = vsyncpa [#allocation10 + $0x1], 1 }
 0x341   :  { %614 = vsyncpa [#allocation5], 1 }
 0x342   :  { %616 = vsyncpa [#allocation5 + $0x1], 1 }
 0x343   :  { %617 = vsyncpa [#allocation13], 1 }
 0x344   :  { %619 = vsyncpa [#allocation13 + $0x1], 1 }

</bundles_post_ra>
